<compile_context>
chip_gen: v6e
topology: v6e:2x2x1
jax: 0.10.0
libtpu: 0.0.40
codegen_flags: <defaults>
</compile_context>

<pallas_src>
import jax
import jax.numpy as jnp
from jax import lax
from jax.experimental import pallas as pl
from jax.experimental.pallas import tpu as pltpu


def _round_up(x, m):
    return (x + m - 1) // m * m


def rnn_seq_kernel(x_ref, h0_ref, whh_ref, bcell_ref, wdec_ref, bdec_ref,
                   logits_ref, hout_ref):
    # x_ref:      (T, Bp, Hp) f32  pre-gathered & pre-folded  emb[token_t] @ W_ih^T
    # h0_ref:     (Bp, Hp)    f32  initial hidden state
    # whh_ref:    (Hp, Hp)    f32  W_hh^T
    # bcell_ref:  (1, Hp)     f32  b_ih + b_hh
    # wdec_ref:   (Hp, Op)    f32  W_dec^T
    # bdec_ref:   (1, Op)     f32  b_dec
    # logits_ref: (T, Bp, Op) f32  per-step logits (one VMEM slab, written in place)
    # hout_ref:   (Bp, Hp)    f32  final hidden state (written once, after the loop)
    T, Bp, Hp = x_ref.shape
    Op = logits_ref.shape[-1]

    # Hoist weight loads and bias broadcasts out of the time loop.
    w_hh = whh_ref[...]
    w_dec = wdec_ref[...]
    b_cell = jnp.broadcast_to(bcell_ref[...], (Bp, Hp))
    b_dec = jnp.broadcast_to(bdec_ref[...], (Bp, Op))

    def step(t, h):
        # tanh RNN cell: x_t already contains emb[token_t] @ W_ih^T.
        pre = x_ref[t] + jnp.dot(h, w_hh, preferred_element_type=jnp.float32) + b_cell
        h_new = jnp.tanh(pre)                      # padded lanes stay exactly 0
        # Decoder.
        logits_ref[t] = jnp.dot(h_new, w_dec,
                                preferred_element_type=jnp.float32) + b_dec
        return h_new

    h_final = lax.fori_loop(0, T, step, h0_ref[...], unroll=True)
    hout_ref[...] = h_final


def prepare_params(params):
    """One-time packing: fold emb @ W_ih^T, transpose, zero-pad to lane-dense 128-wide."""
    emb, w_ih, w_hh, b_ih, b_hh, w_dec, b_dec = params
    V, H = emb.shape
    O = w_dec.shape[0]
    Hp = _round_up(H, 128)
    Op = _round_up(O, 128)
    f32 = jnp.float32

    # Row v of this table is emb[v] @ W_ih^T  (gather commutes with the matmul).
    emb_wih = emb.astype(f32) @ w_ih.T.astype(f32)                       # (V, H)
    emb_wih_p = jnp.zeros((V, Hp), f32).at[:, :H].set(emb_wih)
    w_hh_p = jnp.zeros((Hp, Hp), f32).at[:H, :H].set(w_hh.T.astype(f32))
    b_cell = jnp.zeros((1, Hp), f32).at[0, :H].set((b_ih + b_hh).astype(f32))
    w_dec_p = jnp.zeros((Hp, Op), f32).at[:H, :O].set(w_dec.T.astype(f32))
    b_dec_p = jnp.zeros((1, Op), f32).at[0, :O].set(b_dec.astype(f32))

    return dict(emb_wih=emb_wih_p, w_hh=w_hh_p, b_cell=b_cell,
                w_dec=w_dec_p, b_dec=b_dec_p, V=V, H=H, O=O, Hp=Hp, Op=Op)


def rnn_forward_sequence(token_ids, hidden, packed):
    """token_ids: (T, B) int32; hidden: (1, B, H) f32.
    Returns (logits (T, B, O), hidden (1, B, H))."""
    T, B = token_ids.shape
    H, O, Hp, Op = packed["H"], packed["O"], packed["Hp"], packed["Op"]
    Bp = _round_up(B, 8)

    # Whole-sequence embedding+input-projection gather done ONCE outside the kernel.
    x_seq = jnp.take(packed["emb_wih"], token_ids.astype(jnp.int32), axis=0)  # (T, B, Hp)
    x_seq_p = jnp.zeros((T, Bp, Hp), jnp.float32).at[:, :B, :].set(x_seq)
    h0_p = jnp.zeros((Bp, Hp), jnp.float32).at[:B, :H].set(hidden[0].astype(jnp.float32))

    vmem = pl.BlockSpec(memory_space=pltpu.MemorySpace.VMEM)
    logits_p, h_last_p = pl.pallas_call(
        rnn_seq_kernel,
        out_shape=(jax.ShapeDtypeStruct((T, Bp, Op), jnp.float32),
                   jax.ShapeDtypeStruct((Bp, Hp), jnp.float32)),
        in_specs=[vmem] * 6,
        out_specs=(vmem, vmem),
    )(x_seq_p, h0_p, packed["w_hh"], packed["b_cell"], packed["w_dec"], packed["b_dec"])

    # Padded rows/lanes are discarded here (they computed throwaway values by design).
    return logits_p[:, :B, :O], h_last_p[None, :B, :H]


def rnn_forward(token_ids, hidden, packed):
    """Single-step forward matching the PyTorch module's forward(input, hidden).
    token_ids: (B,) int32; hidden: (1, B, H). Returns (logits (B, O), hidden (1, B, H))."""
    logits_all, h_new = rnn_forward_sequence(token_ids[None], hidden, packed)
    return logits_all[0], h_new


def init_params(key, input_size, hidden_size, output_size):
    """Deterministic parameter init mirroring PyTorch default shapes/ranges."""
    k_emb, k1, k2, k3, k4, k5, k6 = jax.random.split(key, 7)
    bound = 1.0 / jnp.sqrt(hidden_size)
    emb = jax.random.normal(k_emb, (input_size, hidden_size), jnp.float32)   # nn.Embedding ~ N(0,1)
    w_ih = jax.random.uniform(k1, (hidden_size, hidden_size), jnp.float32, -bound, bound)
    w_hh = jax.random.uniform(k2, (hidden_size, hidden_size), jnp.float32, -bound, bound)
    b_ih = jax.random.uniform(k3, (hidden_size,), jnp.float32, -bound, bound)
    b_hh = jax.random.uniform(k4, (hidden_size,), jnp.float32, -bound, bound)
    w_dec = jax.random.uniform(k5, (output_size, hidden_size), jnp.float32, -bound, bound)
    b_dec = jax.random.uniform(k6, (output_size,), jnp.float32, -bound, bound)
    return emb, w_ih, w_hh, b_ih, b_hh, w_dec, b_dec


def reference_forward_sequence(token_ids, hidden, params):
    """Pure-JAX reference of the PyTorch forward applied over a sequence."""
    emb, w_ih, w_hh, b_ih, b_hh, w_dec, b_dec = params
    h = hidden[0]
    outs = []
    for t in range(token_ids.shape[0]):
        x = jnp.take(emb, token_ids[t], axis=0)
        h = jnp.tanh(x @ w_ih.T + b_ih + h @ w_hh.T + b_hh)
        outs.append(h @ w_dec.T + b_dec)
    return jnp.stack(outs), h[None]


if __name__ == "__main__":
    # Small shapes consistent with the module: vocab=64, hidden=32, output=64, batch=8, seq=16.
    input_size = 64      # vocabulary size (nn.Embedding num_embeddings)
    hidden_size = 32
    output_size = 64
    batch = 8
    seq_len = 16
    n_layers = 1

    key = jax.random.PRNGKey(0)
    k_param, k_ids = jax.random.split(key)
    params = init_params(k_param, input_size, hidden_size, output_size)
    packed = prepare_params(params)     # fold / transpose / pad ONCE, reused every call

    token_seq = jax.random.randint(k_ids, (seq_len, batch), 0, input_size, dtype=jnp.int32)
    hidden = jnp.zeros((n_layers, batch, hidden_size), jnp.float32)   # RNN.init_hidden

    fwd_step = jax.jit(lambda ids, h: rnn_forward(ids, h, packed))
    fwd_seq = jax.jit(lambda ids, h: rnn_forward_sequence(ids, h, packed))

    # 1) Single-step forward (exact PyTorch module semantics).
    logits1, hidden1 = fwd_step(token_seq[0], hidden)
    logits1 = jax.block_until_ready(logits1)
    hidden1 = jax.block_until_ready(hidden1)
    ref_logits1, ref_hidden1 = reference_forward_sequence(token_seq[:1], hidden, params)
    assert logits1.shape == (batch, output_size)
    assert hidden1.shape == (n_layers, batch, hidden_size)
    assert jnp.allclose(logits1, ref_logits1[0], atol=1e-4, rtol=1e-4)
    assert jnp.allclose(hidden1, ref_hidden1, atol=1e-4, rtol=1e-4)

    # 2) Full-sequence forward (ONE pallas_call, in-kernel unrolled time loop).
    logits_seq, hidden_seq = fwd_seq(token_seq, hidden)
    logits_seq = jax.block_until_ready(logits_seq)
    hidden_seq = jax.block_until_ready(hidden_seq)
    ref_logits_seq, ref_hidden_seq = reference_forward_sequence(token_seq, hidden, params)
    assert logits_seq.shape == (seq_len, batch, output_size)
    assert hidden_seq.shape == (n_layers, batch, hidden_size)
    assert jnp.allclose(logits_seq, ref_logits_seq, atol=1e-4, rtol=1e-4)
    assert jnp.allclose(hidden_seq, ref_hidden_seq, atol=1e-4, rtol=1e-4)

    print("KERNEL_OK")
</pallas_src>

<mosaic_0001>
module attributes {stable_mosaic.version = 11 : i64} {
  func.func @rnn_seq_kernel(%arg0: memref<1x8x128xf32, #tpu.memory_space<vmem>>, %arg1: memref<8x128xf32, #tpu.memory_space<vmem>>, %arg2: memref<128x128xf32, #tpu.memory_space<vmem>>, %arg3: memref<1x128xf32, #tpu.memory_space<vmem>>, %arg4: memref<128x128xf32, #tpu.memory_space<vmem>>, %arg5: memref<1x128xf32, #tpu.memory_space<vmem>>, %arg6: memref<1x8x128xf32, #tpu.memory_space<vmem>>, %arg7: memref<8x128xf32, #tpu.memory_space<vmem>>) attributes {dimension_semantics = [], scalar_prefetch = 0 : i64, scratch_operands = 0 : i64, tpu.core_type = #tpu.core_type<tc>} {
    %c0 = arith.constant 0 : index
    %c0_0 = arith.constant 0 : index
    %0 = vector.load %arg2[%c0, %c0_0] : memref<128x128xf32, #tpu.memory_space<vmem>>, vector<128x128xf32>
    %c0_1 = arith.constant 0 : index
    %c0_2 = arith.constant 0 : index
    %1 = vector.load %arg4[%c0_1, %c0_2] : memref<128x128xf32, #tpu.memory_space<vmem>>, vector<128x128xf32>
    %c0_3 = arith.constant 0 : index
    %c0_4 = arith.constant 0 : index
    %2 = vector.load %arg3[%c0_3, %c0_4] : memref<1x128xf32, #tpu.memory_space<vmem>>, vector<1x128xf32>
    %3 = vector.shape_cast %2 : vector<1x128xf32> to vector<1x128xf32>
    %4 = vector.broadcast %3 : vector<1x128xf32> to vector<8x128xf32>
    %c0_5 = arith.constant 0 : index
    %c0_6 = arith.constant 0 : index
    %5 = vector.load %arg5[%c0_5, %c0_6] : memref<1x128xf32, #tpu.memory_space<vmem>>, vector<1x128xf32>
    %6 = vector.shape_cast %5 : vector<1x128xf32> to vector<1x128xf32>
    %7 = vector.broadcast %6 : vector<1x128xf32> to vector<8x128xf32>
    %c0_7 = arith.constant 0 : index
    %c0_8 = arith.constant 0 : index
    %8 = vector.load %arg1[%c0_7, %c0_8] : memref<8x128xf32, #tpu.memory_space<vmem>>, vector<8x128xf32>
    %c0_i32 = arith.constant 0 : i32
    %9 = arith.index_cast %c0_i32 : i32 to index
    %c0_9 = arith.constant 0 : index
    %c0_10 = arith.constant 0 : index
    %10 = vector.load %arg0[%9, %c0_9, %c0_10] : memref<1x8x128xf32, #tpu.memory_space<vmem>>, vector<1x8x128xf32>
    %11 = vector.shape_cast %10 : vector<1x8x128xf32> to vector<8x128xf32>
    %cst = arith.constant dense<0.000000e+00> : vector<8x128xf32>
    %12 = tpu.matmul %8, %0, %cst {dimension_numbers = #tpu.dot_dimension_numbers<[1], [0], [0], [1], [0, 0, 1, 1], [], []>} : vector<8x128xf32>, vector<128x128xf32>, vector<8x128xf32> -> vector<8x128xf32>
    %13 = arith.addf %11, %12 : vector<8x128xf32>
    %14 = arith.addf %13, %4 : vector<8x128xf32>
    %15 = math.tanh %14 : vector<8x128xf32>
    %cst_11 = arith.constant dense<0.000000e+00> : vector<8x128xf32>
    %16 = tpu.matmul %15, %1, %cst_11 {dimension_numbers = #tpu.dot_dimension_numbers<[1], [0], [0], [1], [0, 0, 1, 1], [], []>} : vector<8x128xf32>, vector<128x128xf32>, vector<8x128xf32> -> vector<8x128xf32>
    %17 = arith.addf %16, %7 : vector<8x128xf32>
    %18 = arith.index_cast %c0_i32 : i32 to index
    %c0_12 = arith.constant 0 : index
    %c0_13 = arith.constant 0 : index
    %19 = vector.load %arg6[%18, %c0_12, %c0_13] : memref<1x8x128xf32, #tpu.memory_space<vmem>>, vector<1x8x128xf32>
    %20 = vector.shape_cast %19 : vector<1x8x128xf32> to vector<8x128xf32>
    %21 = vector.shape_cast %17 : vector<8x128xf32> to vector<1x8x128xf32>
    tpu.vector_store %arg6[%18, %c0_12, %c0_13], %21 {strides = array<i32>} : memref<1x8x128xf32, #tpu.memory_space<vmem>>, vector<1x8x128xf32>,
    %c1_i32 = arith.constant 1 : i32
    %c0_14 = arith.constant 0 : index
    %c0_15 = arith.constant 0 : index
    %22 = vector.load %arg7[%c0_14, %c0_15] : memref<8x128xf32, #tpu.memory_space<vmem>>, vector<8x128xf32>
    tpu.vector_store %arg7[%c0_14, %c0_15], %15 {strides = array<i32>} : memref<8x128xf32, #tpu.memory_space<vmem>>, vector<8x128xf32>,
    return
  }
}

</mosaic_0001>

<bundles_post_ra>
// kernel: _lambda_.1
= control target key start
LH: loop header
LB: loop body
LE: loop exit
PB: predicated region body
PF: predicated region fallthrough
CT: control target
= control target key end

     0   :  { %13 = vsyncpa [#allocation3], 0  ;;  %s376_s24 = smov [#allocation2]   ;;  %s524_s0 = inlined_call_operand.vmem [shape: f32[1,8,128], index: 0, kind: input, shape index: {}]   ;;  %s525_s1 = inlined_call_operand.vmem [shape: f32[8,128], index: 1, kind: input, shape index: {}]   ;;  %s526_s2 = inlined_call_operand.hbm [shape: f32[128,128], index: 2, kind: input, shape index: {}]   ;;  %s527_s3 = inlined_call_operand.vmem [shape: f32[1,128], index: 3, kind: input, shape index: {}]   ;;  %s528_s4 = inlined_call_operand.vmem [shape: f32[128,128], index: 4, kind: input, shape index: {}]   ;;  %s529_s5 = inlined_call_operand.vmem [shape: f32[1,128], index: 5, kind: input, shape index: {}]   ;;  %s530_s6 = inlined_call_operand.vmem [shape: f32[1,8,128], index: 6, kind: output, shape index: {0}]   ;;  %s531_s7 = inlined_call_operand.vmem [shape: f32[8,128], index: 7, kind: output, shape index: {1}]  }
   0x1   :  { %s23_s25 = sshll.u32 %s376_s24, 4  ;;  %s24_s25 = int_to_ptr.vmem [resolvable:$true] %s23_s25 }
   0x2   :  { %s362_s26 = scalar_lea.vmem %s24_s25, 2048  ;;  %p367_p1 = scmp.lt.s32.totalorder %s24_s25, %s24_s25 }
   0x3   :  { %p363_p0 = scmp.ne.s32.totalorder %s24_s25, %s362_s26  ;;  %p368_p2 = scmp.lt.s32.totalorder %s362_s26, %s362_s26 }
   0x5   :  { %p369_p3 = por %p368_p2, %p367_p1 }
   0x7   :  { %p370_p4 = pnand %p369_p3, %p363_p0 }
   0x9   :  { %373 = shalt.err (!%p370_p4)
}
   0xa   :  { %s377_s27 = smov 128   ;;  %s378_s28 = smov 8  }
   0xb   :  { %29 = dma.hbm_to_vmem [thread:$0]  %s526_s2, 2048, %s24_s25, [#allocation3], %s377_s27, %s377_s27, %s378_s28  }
   0xc   :  { %374 = dma.done.wait [#allocation3], 2048  }
   0xd   :  { %375 = vsyncadd [#allocation3], 4294965248  ;;  %v379_v0 = vmov 0.0   ;;  %vm380_vm0 = vmmov 0   ;;  %v54_v1 = vld [vmem:[#allocation2 + $0x78] sm:$0xff]  ;;  %v53_v2 = vld [vmem:[#allocation2 + $0x70] sm:$0xff] }
   0xe   :  { %277 = vmatprep.subr.mxu0 %v379_v0  ;;  %309 = vmatprep.mubr.msk.f32.mxu0 %vm380_vm0, %v379_v0  ;;  %v52_v3 = vld [vmem:[#allocation2 + $0x68] sm:$0xff]  ;;  %v51_v4 = vld [vmem:[#allocation2 + $0x60] sm:$0xff]  ;;  %v70_v5 = vld [vmem:[%s528_s4 + $0x78] sm:$0xff] }
   0xf   :  { %312 = vmatprep.subr.mxu1 %v379_v0  ;;  %344 = vmatprep.mubr.msk.f32.mxu1 %vm380_vm0, %v379_v0  ;;  %v50_v6 = vld [vmem:[#allocation2 + $0x58] sm:$0xff]  ;;  %v69_v7 = vld [vmem:[%s528_s4 + $0x70] sm:$0xff]  ;;  %v68_v8 = vld [vmem:[%s528_s4 + $0x68] sm:$0xff] }
  0x10   :  { %278 = vmatpush3.msra.mxu0 %v54_v1  ;;  %313 = vmatpush3.msra.mxu1 %v70_v5  ;;  %v49_v9 = vld [vmem:[#allocation2 + $0x50] sm:$0xff]  ;;  %v67_v10 = vld [vmem:[%s528_s4 + $0x60] sm:$0xff]  ;;  %v48_v11 = vld [vmem:[#allocation2 + $0x48] sm:$0xff] }
  0x11   :  { %279 = vmatprep.subr.mxu0 %v379_v0  ;;  %314 = vmatprep.subr.mxu1 %v379_v0  ;;  %v66_v12 = vld [vmem:[%s528_s4 + $0x58] sm:$0xff]  ;;  %v47_v13 = vld [vmem:[#allocation2 + $0x40] sm:$0xff]  ;;  %v65_v14 = vld [vmem:[%s528_s4 + $0x50] sm:$0xff] }
  0x12   :  { %280 = vmatpush3.msra.mxu0 %v53_v2  ;;  %315 = vmatpush3.msra.mxu1 %v69_v7  ;;  %v46_v15 = vld [vmem:[#allocation2 + $0x38] sm:$0xff]  ;;  %v45_v16 = vld [vmem:[#allocation2 + $0x30] sm:$0xff]  ;;  %v44_v17 = vld [vmem:[#allocation2 + $0x28] sm:$0xff] }
  0x13   :  { %281 = vmatprep.subr.mxu0 %v379_v0  ;;  %316 = vmatprep.subr.mxu1 %v379_v0  ;;  %v43_v18 = vld [vmem:[#allocation2 + $0x20] sm:$0xff]  ;;  %v42_v19 = vld [vmem:[#allocation2 + $0x18] sm:$0xff]  ;;  %v41_v20 = vld [vmem:[#allocation2 + $0x10] sm:$0xff] }
  0x14   :  { %282 = vmatpush3.msra.mxu0 %v52_v3  ;;  %317 = vmatpush3.msra.mxu1 %v68_v8  ;;  %v40_v21 = vld [vmem:[#allocation2 + $0x8] sm:$0xff]  ;;  %v39_v22 = vld [vmem:[#allocation2] sm:$0xff]  ;;  %v62_v26 = vld [vmem:[%s528_s4 + $0x38] sm:$0xff] }
  0x15   :  { %283 = vmatprep.subr.mxu0 %v379_v0  ;;  %318 = vmatprep.subr.mxu1 %v379_v0  ;;  %v85_v23 = vld [vmem:[%s525_s1] sm:$0xff]  ;;  %v64_v24 = vld [vmem:[%s528_s4 + $0x48] sm:$0xff]  ;;  %v61_v27 = vld [vmem:[%s528_s4 + $0x30] sm:$0xff] }
  0x16   :  { %284 = vmatpush3.msra.mxu0 %v51_v4  ;;  %319 = vmatpush3.msra.mxu1 %v67_v10  ;;  %v63_v25 = vld [vmem:[%s528_s4 + $0x40] sm:$0xff]  ;;  %v60_v28 = vld [vmem:[%s528_s4 + $0x28] sm:$0xff]  ;;  %v58_v30 = vld [vmem:[%s528_s4 + $0x18] sm:$0xff] }
  0x17   :  { %285 = vmatprep.subr.mxu0 %v379_v0  ;;  %320 = vmatprep.subr.mxu1 %v379_v0  ;;  %v59_v29 = vld [vmem:[%s528_s4 + $0x20] sm:$0xff]  ;;  %v57_v31 = vld [vmem:[%s528_s4 + $0x10] sm:$0xff]  ;;  %v56_v32 = vld [vmem:[%s528_s4 + $0x8] sm:$0xff] }
  0x18   :  { %286 = vmatpush3.msra.mxu0 %v50_v6  ;;  %321 = vmatpush3.msra.mxu1 %v66_v12  ;;  %v55_v33 = vld [vmem:[%s528_s4] sm:$0xff] }
  0x19   :  { %287 = vmatprep.subr.mxu0 %v379_v0  ;;  %322 = vmatprep.subr.mxu1 %v379_v0  ;;  %v86_v34 = vld [vmem:[%s524_s0] sm:$0xff] }
  0x1a   :  { %288 = vmatpush3.msra.mxu0 %v49_v9  ;;  %323 = vmatpush3.msra.mxu1 %v65_v14  ;;  %v241_v35 = vld [vmem:[%s527_s3] ss:$0 sm:$0xff] }
  0x1b   :  { %289 = vmatprep.subr.mxu0 %v379_v0  ;;  %324 = vmatprep.subr.mxu1 %v379_v0  ;;  %v242_v41 = vld [vmem:[%s529_s5] ss:$0 sm:$0xff] }
  0x1c   :  { %290 = vmatpush3.msra.mxu0 %v48_v11  ;;  %325 = vmatpush3.msra.mxu1 %v64_v24 }
  0x1d   :  { %291 = vmatprep.subr.mxu0 %v379_v0  ;;  %326 = vmatprep.subr.mxu1 %v379_v0 }
  0x1e   :  { %292 = vmatpush3.msra.mxu0 %v47_v13  ;;  %327 = vmatpush3.msra.mxu1 %v63_v25 }
  0x1f   :  { %293 = vmatprep.subr.mxu0 %v379_v0  ;;  %328 = vmatprep.subr.mxu1 %v379_v0 }
  0x20   :  { %294 = vmatpush3.msra.mxu0 %v46_v15  ;;  %329 = vmatpush3.msra.mxu1 %v62_v26 }
  0x21   :  { %295 = vmatprep.subr.mxu0 %v379_v0  ;;  %330 = vmatprep.subr.mxu1 %v379_v0 }
  0x22   :  { %296 = vmatpush3.msra.mxu0 %v45_v16  ;;  %331 = vmatpush3.msra.mxu1 %v61_v27 }
  0x23   :  { %297 = vmatprep.subr.mxu0 %v379_v0  ;;  %332 = vmatprep.subr.mxu1 %v379_v0 }
  0x24   :  { %298 = vmatpush3.msra.mxu0 %v44_v17  ;;  %333 = vmatpush3.msra.mxu1 %v60_v28 }
  0x25   :  { %299 = vmatprep.subr.mxu0 %v379_v0  ;;  %334 = vmatprep.subr.mxu1 %v379_v0 }
  0x26   :  { %300 = vmatpush3.msra.mxu0 %v43_v18  ;;  %335 = vmatpush3.msra.mxu1 %v59_v29 }
  0x27   :  { %301 = vmatprep.subr.mxu0 %v379_v0  ;;  %336 = vmatprep.subr.mxu1 %v379_v0 }
  0x28   :  { %302 = vmatpush3.msra.mxu0 %v42_v19  ;;  %337 = vmatpush3.msra.mxu1 %v58_v30 }
  0x29   :  { %303 = vmatprep.subr.mxu0 %v379_v0  ;;  %338 = vmatprep.subr.mxu1 %v379_v0 }
  0x2a   :  { %304 = vmatpush3.msra.mxu0 %v41_v20  ;;  %339 = vmatpush3.msra.mxu1 %v57_v31 }
  0x2b   :  { %305 = vmatprep.subr.mxu0 %v379_v0  ;;  %340 = vmatprep.subr.mxu1 %v379_v0 }
  0x2c   :  { %306 = vmatpush3.msra.mxu0 %v40_v21  ;;  %341 = vmatpush3.msra.mxu1 %v56_v32 }
  0x2d   :  { %307 = vmatprep.subr.mxu0 %v379_v0  ;;  %342 = vmatprep.subr.mxu1 %v379_v0 }
  0x2e   :  { %308 = vmatpush3.msra.mxu0 %v39_v22  ;;  %343 = vmatpush3.msra.mxu1 %v55_v33 }
  0x2f   :  { %310 = vmatmul.mubr.f32.vlgmr.msra.gmra.mxu0 %v85_v23 }
  0xef   :  { %v153_v36 = vpop.f32.mrf.mxu0 }
  0xf0   :  { %v157_v37 = vadd.f32 %v153_v36, %v86_v34 }
  0xf1   :  { %v311_v38 = vpop.f32.mrf.mxu0 }
  0xf2   :  { %v158_v39 = vadd.f32 %v241_v35, %v157_v37 }
  0xf4   :  { %352 = vtanh.f32 %v158_v39 }
 0x101   :  { %v353_v40 = vpop.eup %352 }
 0x102   :  { %231 = vst [vmem:[%s531_s7] sm:$0xff] %v353_v40  ;;  %345 = vmatmul.mubr.f32.vlgmr.msra.gmra.mxu1 %v353_v40 }
 0x1c2   :  { %v226_v42 = vpop.f32.mrf.mxu1 }
 0x1c3   :  { %v227_v43 = vadd.f32 %v242_v41, %v226_v42 }
 0x1c4   :  { %v346_v44 = vpop.f32.mrf.mxu1 }
 0x1c5   :  { %230 = vst [vmem:[%s530_s6] sm:$0xff] %v227_v43 }
 0x1c6   :  { %240 = vsyncpa [#allocation3], 1 }

</bundles_post_ra>
